<compile_context>
chip_gen: v5e
topology: v5e:2x2
jax: 0.10.0
libtpu: 0.0.40
codegen_flags: <defaults>
</compile_context>

<pallas_src>
import jax
import jax.numpy as jnp
from jax.experimental import pallas as pl
from jax.experimental.pallas import tpu as pltpu


def _linear_hardswish_kernel(x_ref, w_ref, b_ref, o_ref):
    # in_features == 1, so the Linear layer is just an outer product.
    # Skip the MXU (pure fill latency at contraction depth 1) and do a
    # VPU broadcast multiply-add: (N,1)*(1,F)+(1,F) -> (N,F).
    v1 = x_ref[...] * w_ref[...] + b_ref[...]
    # hard-swish: v1 * clamp(v1 + 3, 0, 6) / 6
    # -> one add, one clamp (min/max pair), two muls, all on the VPU.
    t = jnp.minimum(jnp.maximum(v1 + 3.0, 0.0), 6.0)
    o_ref[...] = v1 * t * (1.0 / 6.0)


def linear_hardswish(x, w_t, b_row):
    """x: (N, K=1), w_t: (K=1, F), b_row: (1, F) -> (N, F)."""
    N, K = x.shape
    _, F = w_t.shape
    vmem = pltpu.MemorySpace.VMEM
    return pl.pallas_call(
        _linear_hardswish_kernel,
        out_shape=jax.ShapeDtypeStruct((N, F), jnp.float32),
        # Tiny problem (~12 KB total): single grid point, full-array blocks.
        # F = 512 is kept as one lane-dense block (multiple of 128 lanes), so
        # the output store is an unmasked vst.  No grid / pipelining needed.
        in_specs=[
            pl.BlockSpec((N, K), lambda: (0, 0), memory_space=vmem),
            pl.BlockSpec((K, F), lambda: (0, 0), memory_space=vmem),
            pl.BlockSpec((1, F), lambda: (0, 0), memory_space=vmem),
        ],
        out_specs=pl.BlockSpec((N, F), lambda: (0, 0), memory_space=vmem),
    )(x, w_t, b_row)
    # TODO(synk): if this sits inside a larger model, fuse it into the
    # neighboring op's kernel — at this size wall clock is pallas_call overhead.


if __name__ == "__main__":
    key = jax.random.PRNGKey(0)
    kx, kw, kb = jax.random.split(key, 3)

    # Input consistent with the module: x1 = torch.randn(4, 1)
    x1 = jax.random.normal(kx, (4, 1), dtype=jnp.float32)

    # Deterministic parameter init mimicking nn.Linear(1, 512):
    # weight (out=512, in=1) ~ U(-1/sqrt(in), 1/sqrt(in)), bias same range.
    bound = 1.0  # 1 / sqrt(1)
    weight = jax.random.uniform(kw, (512, 1), dtype=jnp.float32,
                                minval=-bound, maxval=bound)
    bias = jax.random.uniform(kb, (512,), dtype=jnp.float32,
                              minval=-bound, maxval=bound)

    w_t = weight.T                # (1, 512)
    b_row = bias.reshape(1, 512)  # (1, 512)

    out = linear_hardswish(x1, w_t, b_row)
    out = jax.block_until_ready(out)

    # Reference check in plain JAX (same math as the PyTorch forward).
    v1 = x1 @ w_t + b_row
    ref = v1 * jnp.clip(v1 + 3.0, 0.0, 6.0) / 6.0
    assert out.shape == (4, 512)
    assert jnp.allclose(out, ref, atol=1e-5, rtol=1e-5)

    print("KERNEL_OK")
</pallas_src>

<mosaic_0001>
module attributes {stable_mosaic.version = 11 : i64} {
  func.func @_linear_hardswish_kernel(%arg0: memref<4x1xf32, #tpu.memory_space<vmem>>, %arg1: memref<1x512xf32, #tpu.memory_space<vmem>>, %arg2: memref<1x512xf32, #tpu.memory_space<vmem>>, %arg3: memref<4x512xf32, #tpu.memory_space<vmem>>) attributes {dimension_semantics = [], scalar_prefetch = 0 : i64, scratch_operands = 0 : i64, tpu.core_type = #tpu.core_type<tc>} {
    %c0 = arith.constant 0 : index
    %c0_0 = arith.constant 0 : index
    %0 = vector.load %arg0[%c0, %c0_0] : memref<4x1xf32, #tpu.memory_space<vmem>>, vector<4x1xf32>
    %c0_1 = arith.constant 0 : index
    %c0_2 = arith.constant 0 : index
    %1 = vector.load %arg1[%c0_1, %c0_2] : memref<1x512xf32, #tpu.memory_space<vmem>>, vector<1x512xf32>
    %2 = vector.broadcast %0 : vector<4x1xf32> to vector<4x512xf32>
    %3 = vector.broadcast %1 : vector<1x512xf32> to vector<4x512xf32>
    %4 = arith.mulf %2, %3 : vector<4x512xf32>
    %c0_3 = arith.constant 0 : index
    %c0_4 = arith.constant 0 : index
    %5 = vector.load %arg2[%c0_3, %c0_4] : memref<1x512xf32, #tpu.memory_space<vmem>>, vector<1x512xf32>
    %6 = vector.broadcast %5 : vector<1x512xf32> to vector<4x512xf32>
    %7 = arith.addf %4, %6 : vector<4x512xf32>
    %cst = arith.constant 3.000000e+00 : f32
    %8 = vector.broadcast %cst : f32 to vector<4x512xf32>
    %9 = arith.addf %7, %8 : vector<4x512xf32>
    %cst_5 = arith.constant 0.000000e+00 : f32
    %10 = vector.broadcast %cst_5 : f32 to vector<4x512xf32>
    %11 = arith.maximumf %9, %10 : vector<4x512xf32>
    %cst_6 = arith.constant 6.000000e+00 : f32
    %12 = vector.broadcast %cst_6 : f32 to vector<4x512xf32>
    %13 = arith.minimumf %11, %12 : vector<4x512xf32>
    %14 = arith.mulf %7, %13 : vector<4x512xf32>
    %cst_7 = arith.constant 0.166666672 : f32
    %15 = vector.broadcast %cst_7 : f32 to vector<4x512xf32>
    %16 = arith.mulf %14, %15 : vector<4x512xf32>
    %c0_8 = arith.constant 0 : index
    %c0_9 = arith.constant 0 : index
    %17 = vector.load %arg3[%c0_8, %c0_9] : memref<4x512xf32, #tpu.memory_space<vmem>>, vector<4x512xf32>
    tpu.vector_store %arg3[%c0_8, %c0_9], %16 {strides = array<i32>} : memref<4x512xf32, #tpu.memory_space<vmem>>, vector<4x512xf32>,
    return
  }
}

</mosaic_0001>

<bundles_post_ra>
// kernel: tpu_custom_call.1
= control target key start
LH: loop header
LB: loop body
LE: loop exit
PB: predicated region body
PF: predicated region fallthrough
CT: control target
= control target key end

     0   :  { %8 = vsyncpa [#allocation3], 0  ;;  %s204_s0 = inlined_call_operand.vmem [shape: f32[4,1], index: 0, kind: input, shape index: {}]   ;;  %s205_s1 = inlined_call_operand.vmem [shape: f32[1,512], index: 1, kind: input, shape index: {}]   ;;  %s206_s2 = inlined_call_operand.hbm [shape: f32[1,512], index: 2, kind: input, shape index: {}]   ;;  %s207_s3 = inlined_call_operand.hbm [shape: f32[4,512], index: 3, kind: output, shape index: {}]  }
   0x1   :  { %9 = vsyncpa [#allocation4], 0  ;;  %s19_s14 = sshll.u32 %s206_s2, 4  ;;  %s169_s15 = smov [#allocation2]   ;;  %s20_s14 = int_to_ptr.hbm [resolvable:$true] %s19_s14 }
   0x2   :  { %s21_s16 = sshll.u32 %s169_s15, 4  ;;  %s22_s16 = int_to_ptr.vmem [resolvable:$true] %s21_s16 }
   0x3   :  { %24 = dma.hbm_to_vmem [thread:$0]  %s20_s14, 64, %s22_s16, [#allocation3]  }
   0x4   :  { %165 = dma.done.wait [#allocation3], 64  }
   0x5   :  { %166 = vsyncadd [#allocation3], 4294967232  ;;  %v170_v0 = vmov 0   ;;  %v29_v1 = vld [vmem:[%s204_s0] sm:$0xf]  ;;  %vm89_vm0 = vcmask 1043456  }
   0x6   :  { %116 = vset.pattern.permute.xlu0 %v170_v0  ;;  %v30_v2 = vld [vmem:[%s205_s1] sm:$0xf]  ;;  %s171_s0 = smov [#allocation5]   ;;  %s103_s22 = sshll.u32 %s207_s3, 4  ;;  %s104_s22 = int_to_ptr.hbm [resolvable:$true] %s103_s22 }
   0x7   :  { %33 = vperm.xlu0 %116, %v29_v1   ;;  %v49_v3 = vld [vmem:[#allocation2] sm:$0xf]  ;;  %v37_v4 = vperm.slane %v30_v2, 0  ;;  %v38_v5 = vperm.slane %v30_v2, 1  ;;  %v39_v6 = vperm.slane %v30_v2, 2  ;;  %v40_v7 = vperm.slane %v30_v2, 3 }
   0x8   :  { %v51_v8 = vperm.slane %v49_v3, 0  ;;  %v52_v9 = vperm.slane %v49_v3, 1  ;;  %v53_v10 = vperm.slane %v49_v3, 2  ;;  %v54_v11 = vperm.slane %v49_v3, 3  ;;  %s101_s1 = sshll.u32 %s171_s0, 4  ;;  %s102_s1 = int_to_ptr.vmem [resolvable:$true] %s101_s1 }
  0x79   :  { %v34_v12 = vpop.permute.xlu0 %33 }
  0x7a   :  { %v45_v13 = vmul.f32 %v37_v4, %v34_v12  ;;  %v46_v14 = vmul.f32 %v38_v5, %v34_v12  ;;  %v47_v15 = vmul.f32 %v39_v6, %v34_v12  ;;  %v48_v16 = vmul.f32 %v40_v7, %v34_v12 }
  0x7c   :  { %v59_v17 = vadd.f32 %v51_v8, %v45_v13  ;;  %v60_v18 = vadd.f32 %v52_v9, %v46_v14  ;;  %v61_v19 = vadd.f32 %v53_v10, %v47_v15  ;;  %v62_v20 = vadd.f32 %v54_v11, %v48_v16 }
  0x7e   :  { %v63_v21 = vadd.f32 3.0, %v59_v17  ;;  %v64_v22 = vadd.f32 3.0, %v60_v18  ;;  %v65_v23 = vadd.f32 3.0, %v61_v19  ;;  %v66_v24 = vadd.f32 3.0, %v62_v20 }
  0x80   :  { %v67_v25 = vmax.f32 %v63_v21, 0.0  ;;  %v68_v26 = vmax.f32 %v64_v22, 0.0  ;;  %v69_v27 = vmax.f32 %v65_v23, 0.0  ;;  %v70_v28 = vmax.f32 %v66_v24, 0.0 }
  0x82   :  { %v71_v29 = vmin.f32 %v67_v25, 6.0  ;;  %v72_v30 = vmin.f32 %v68_v26, 6.0  ;;  %v73_v31 = vmin.f32 %v69_v27, 6.0  ;;  %v74_v32 = vmin.f32 %v70_v28, 6.0 }
  0x84   :  { %v75_v33 = vmul.f32 %v71_v29, %v59_v17  ;;  %v76_v34 = vmul.f32 %v72_v30, %v60_v18  ;;  %v78_v35 = vmul.f32 %v74_v32, %v62_v20  ;;  %v77_v36 = vmul.f32 %v73_v31, %v61_v19 }
  0x86   :  { %v80_v37 = vmul.f32 0.16666667, %v76_v34  ;;  %v82_v38 = vmul.f32 0.16666667, %v78_v35  ;;  %v79_v39 = vmul.f32 0.16666667, %v75_v33 }
  0x87   :  { %v81_v41 = vmul.f32 0.16666667, %v77_v36 }
  0x88   :  { %v87_v40 = vrot.slane %v80_v37, 4  ;;  %v88_v42 = vrot.slane %v82_v38, 4 }
  0x8a   :  { %v90_v43 = vsel %vm89_vm0, %v79_v39, %v87_v40  ;;  %v91_v44 = vsel %vm89_vm0, %v81_v41, %v88_v42 }
  0x8b   :  { %94 = vst [vmem:[#allocation5] sm:$0xff] %v90_v43 }
  0x8c   :  { %95 = vst [vmem:[#allocation5 + $0x8] sm:$0xff] %v91_v44 }
  0x8d   :  { %106 = dma.vmem_to_hbm [thread:$0]  %s102_s1, 256, %s104_s22, [#allocation4]  }
  0x8e   :  { %167 = dma.done.wait [#allocation4], 256  }
  0x8f   :  { %168 = vsyncadd [#allocation4], 4294967040 }
  0x90   :  { %111 = vsyncpa [#allocation3], 1 }
  0x91   :  { %112 = vsyncpa [#allocation4], 1 }

</bundles_post_ra>
